<compile_context>
chip_gen: v7x
topology: tpu7x:2x2x1
jax: 0.10.0
libtpu: 0.0.40
codegen_flags: <defaults>
</compile_context>

<pallas_src>
import re

import jax
import jax.numpy as jnp
from jax.experimental import pallas as pl
from jax.experimental.pallas import tpu as pltpu


# ----------------------------- helpers -------------------------------------


def _cdiv(a, b):
    return -(-a // b)


def _round_up(a, m):
    return _cdiv(a, m) * m


def _choose_tile(dim, target, align=128):
    """Pick (tile, padded_dim): tile is a multiple of `align` (falling back to
    128 for dims smaller than `align`), padded_dim a multiple of tile.  Small
    dims become a single full-size block."""
    if align > 128 and _round_up(dim, 128) < align:
        align = 128
    padded = _round_up(dim, align)
    if padded <= target:
        return padded, padded
    n = _cdiv(padded, target)
    tile = _round_up(_cdiv(padded, n), align)
    return tile, n * tile


def _tpu_generation():
    """Best-effort TPU generation from device_kind ('TPU v6e' -> 6, ...)."""
    try:
        kind = jax.devices()[0].device_kind
    except Exception:  # no accelerator visible at trace time
        return 0
    m = re.search(r"(\d+)", kind)
    return int(m.group(1)) if m else 0


def _tile_targets():
    """Generation-dependent tile targets / alignment / VMEM limit.

    Arithmetic intensity of this schedule is ~1/(1/tm + 1/tn) flops/byte, so
    tm/tn must clear each chip's HBM roofline crossover while the
    double-buffered (x, Wt, out) tiles plus the f32 accumulator fit in VMEM.
    """
    gen = _tpu_generation()
    if gen >= 7:
        # v7x: 64 MiB VMEM per TC, 2 TCs/chip, crossover ~310 flops/byte.
        return dict(tm=512, tn=1024, tk=512, align=256, vmem=48 * 1024 * 1024)
    if gen == 6:
        # v6e: 128 MiB VMEM, crossover ~650-680 flops/byte -> bigger tiles.
        return dict(tm=1024, tn=2048, tk=1024, align=256, vmem=96 * 1024 * 1024)
    if gen == 5:
        # v5e/v5p: crossover ~240 flops/byte, 128-wide MXU groups.
        return dict(tm=512, tn=1024, tk=512, align=128, vmem=64 * 1024 * 1024)
    # Unknown generation: conservative config that fits every chip.
    return dict(tm=512, tn=1024, tk=512, align=128, vmem=48 * 1024 * 1024)


# ----------------------------- kernels --------------------------------------


def _lora_kernel(x_ref, wt_ref, bias_ref, zp_ref, bt_ref, o_ref, acc_ref):
    """Fused base-linear + LoRA up-projection with K-reduction accumulation.

    Per (i, j) output tile, iterated over k:
        k == 0 : acc  = bias (broadcast)                      (tm, tn) f32
        all k  : acc += x_k @ Wt_k                            MXU, f32 acc
        last k : out  = acc + zp @ Bt                         zp = x @ A.T is
                 precomputed once per row tile; Bt has `scale` folded in.
    """
    k = pl.program_id(2)

    @pl.when(k == 0)
    def _init():
        acc_ref[...] = jnp.broadcast_to(bias_ref[...], acc_ref.shape)

    acc_ref[...] += jnp.dot(x_ref[...], wt_ref[...],
                            preferred_element_type=jnp.float32)

    @pl.when(k == pl.num_programs(2) - 1)
    def _finalize():
        lora = jnp.dot(zp_ref[...], bt_ref[...],
                       preferred_element_type=jnp.float32)
        o_ref[...] = (acc_ref[...] + lora).astype(o_ref.dtype)


def _base_kernel(x_ref, wt_ref, bias_ref, o_ref, acc_ref):
    """Plain tiled GEMM + bias (used when LoRA is folded into W_eff)."""
    k = pl.program_id(2)

    @pl.when(k == 0)
    def _init():
        acc_ref[...] = jnp.broadcast_to(bias_ref[...], acc_ref.shape)

    acc_ref[...] += jnp.dot(x_ref[...], wt_ref[...],
                            preferred_element_type=jnp.float32)

    @pl.when(k == pl.num_programs(2) - 1)
    def _finalize():
        o_ref[...] = acc_ref[...].astype(o_ref.dtype)


# ----------------------------- wrappers ------------------------------------


def prepare_lora_params(w_base, b_base, a_w, b_w, *, alpha=16,
                        compute_dtype=jnp.bfloat16,
                        tn_target=None, tk_target=None,
                        fold_lora=False):
    """One-time weight preparation (hoisted out of the per-call hot path):
    transpose, pad to tile-friendly shapes, cast to compute dtype, fold scale
    into Bt.  Weights follow PyTorch conventions: w_base (N,K), b_base (N,),
    a_w (r,K), b_w (N,r).

    fold_lora=True folds W_eff = W.T + A.T @ (scale*B.T) once (frozen-adapter
    inference): the kernel becomes a pure tiled GEMM + bias.
    """
    targets = _tile_targets()
    tn_target = targets["tn"] if tn_target is None else tn_target
    tk_target = targets["tk"] if tk_target is None else tk_target
    align = targets["align"]

    N, K = w_base.shape
    r = a_w.shape[0]
    scale = alpha / r

    tn, Np = _choose_tile(N, tn_target, align)   # lane-dense output tiles
    tk, Kp = _choose_tile(K, tk_target, align)   # contraction tiles

    cd = compute_dtype
    bias = jnp.zeros((1, Np), jnp.float32).at[0, :N].set(
        b_base.astype(jnp.float32))                                        # (1, Np)

    if fold_lora:
        w_eff = (w_base.T.astype(jnp.float32)
                 + a_w.T.astype(jnp.float32)
                 @ (scale * b_w.T.astype(jnp.float32)))                    # (K, N)
        wt = jnp.zeros((Kp, Np), cd).at[:K, :N].set(w_eff.astype(cd))
        return dict(folded=True, wt=wt, bias=bias,
                    N=N, K=K, r=r, Np=Np, Kp=Kp, tn=tn, tk=tk,
                    compute_dtype=cd)

    wt = jnp.zeros((Kp, Np), cd).at[:K, :N].set(w_base.T.astype(cd))          # (Kp, Np)
    at = jnp.zeros((Kp, r), cd).at[:K, :].set(a_w.T.astype(cd))               # (Kp, r)
    bt = jnp.zeros((r, Np), cd).at[:, :N].set((b_w.T * scale).astype(cd))     # (r, Np)
    return dict(folded=False, wt=wt, at=at, bt=bt, bias=bias,
                N=N, K=K, r=r, Np=Np, Kp=Kp, tn=tn, tk=tk,
                compute_dtype=cd)


def lora_adapter_forward(x, params, *, tm_target=None):
    """y = x @ W.T + b + scale * (x @ A.T) @ B.T  for x of shape (M, K)."""
    targets = _tile_targets()
    tm_target = targets["tm"] if tm_target is None else tm_target

    M, K = x.shape
    assert K == params["K"], "input feature dim mismatch"
    N, Np, Kp = params["N"], params["Np"], params["Kp"]
    tn, tk, r = params["tn"], params["tk"], params["r"]
    cd = params["compute_dtype"]
    out_dtype = x.dtype

    # Row tile: 16-aligned (bf16 sublane pair); ragged batches are zero-padded.
    tm, Mp = _choose_tile(M, tm_target, 16)

    # Pad / cast only when actually needed (no extra HBM round trip of the
    # activations for aligned production shapes).
    if Mp != M or Kp != K:
        xp = jnp.zeros((Mp, Kp), cd).at[:M, :K].set(x.astype(cd))
    else:
        xp = x.astype(cd)

    # v7x has 2 TensorCores per chip: ensure >= 2 (i, j) tiles exist so the
    # "parallel" grid axes can spread work across cores.
    if _tpu_generation() >= 7:
        while (Mp // tm) * (Np // tn) < 2 and tn % 256 == 0:
            tn //= 2

    grid = (Mp // tm, Np // tn, Kp // tk)   # (M, N) parallel, K reduction last

    x_spec = pl.BlockSpec((tm, tk), lambda i, j, k: (i, k))
    wt_spec = pl.BlockSpec((tk, tn), lambda i, j, k: (k, j))
    bias_spec = pl.BlockSpec((1, tn), lambda i, j, k: (0, j))
    out_spec = pl.BlockSpec((tm, tn), lambda i, j, k: (i, j))
    compiler_params = pltpu.CompilerParams(
        dimension_semantics=("parallel", "parallel", "arbitrary"),
        vmem_limit_bytes=targets["vmem"],
    )
    scratch = [pltpu.VMEM((tm, tn), jnp.float32)]   # f32 output accumulator

    if params["folded"]:
        out = pl.pallas_call(
            _base_kernel,
            out_shape=jax.ShapeDtypeStruct((Mp, Np), out_dtype),
            grid_spec=pltpu.PrefetchScalarGridSpec(
                num_scalar_prefetch=0,
                grid=grid,
                in_specs=[x_spec, wt_spec, bias_spec],
                out_specs=out_spec,
                scratch_shapes=scratch,
            ),
            compiler_params=compiler_params,
        )(xp, params["wt"], params["bias"])
    else:
        # LoRA down-projection hoisted out of the grid loop: computed once per
        # call (f32 accumulate, then cast), instead of being re-accumulated
        # for every N tile and every K step inside the kernel.
        zp = jnp.dot(xp, params["at"],
                     preferred_element_type=jnp.float32).astype(cd)       # (Mp, r)
        zp_spec = pl.BlockSpec((tm, r), lambda i, j, k: (i, 0))
        bt_spec = pl.BlockSpec((r, tn), lambda i, j, k: (0, j))
        out = pl.pallas_call(
            _lora_kernel,
            out_shape=jax.ShapeDtypeStruct((Mp, Np), out_dtype),
            grid_spec=pltpu.PrefetchScalarGridSpec(
                num_scalar_prefetch=0,
                grid=grid,
                in_specs=[x_spec, wt_spec, bias_spec, zp_spec, bt_spec],
                out_specs=out_spec,
                scratch_shapes=scratch,
            ),
            compiler_params=compiler_params,
        )(xp, params["wt"], params["bias"], zp, params["bt"])

    if Mp != M or Np != N:
        out = out[:M, :N]
    return out


def lora_adapter_ref(x, w_base, b_base, a_w, b_w, *, alpha=16,
                     compute_dtype=jnp.bfloat16):
    """Pure-JAX reference mirroring the kernel's bf16-compute / f32-accumulate."""
    r = a_w.shape[0]
    scale = alpha / r
    cd = compute_dtype
    xb = x.astype(cd)
    base = jnp.dot(xb, w_base.T.astype(cd),
                   preferred_element_type=jnp.float32) + b_base
    z = jnp.dot(xb, a_w.T.astype(cd), preferred_element_type=jnp.float32)
    lora = jnp.dot(z.astype(cd), (b_w.T * scale).astype(cd),
                   preferred_element_type=jnp.float32)
    return (base + lora).astype(x.dtype)


# ----------------------------- demo / test ----------------------------------


if __name__ == "__main__":
    # Small deterministic problem (single grid step at these shapes).
    batch, in_features, out_features, rank, alpha = 16, 64, 128, 4, 16

    key = jax.random.PRNGKey(0)
    kx, kw, kb, ka, kB = jax.random.split(key, 5)

    x = jax.random.normal(kx, (batch, in_features), dtype=jnp.float32)
    w_base = jax.random.normal(kw, (out_features, in_features), jnp.float32) * 0.05
    b_base = jax.random.normal(kb, (out_features,), jnp.float32) * 0.05
    lora_A = jax.random.normal(ka, (rank, in_features), jnp.float32) * 0.05
    # Standard LoRA init is B = 0; use nonzero B so the LoRA path is exercised.
    lora_B = jax.random.normal(kB, (out_features, rank), jnp.float32) * 0.05

    ref = lora_adapter_ref(x, w_base, b_base, lora_A, lora_B, alpha=alpha)

    # 1) Default (un-folded) LoRA path, aligned shapes (no padding copies).
    params = prepare_lora_params(w_base, b_base, lora_A, lora_B, alpha=alpha)
    out = jax.block_until_ready(lora_adapter_forward(x, params))
    assert out.shape == (batch, out_features)
    err = float(jnp.max(jnp.abs(out - ref)))
    assert jnp.allclose(out, ref, atol=2e-2, rtol=2e-2), \
        f"lora path mismatch vs reference (max abs err {err})"

    # 2) Ragged batch -> exercises the conditional padding / output slice path.
    xr = x[:7, :]
    out_r = jax.block_until_ready(lora_adapter_forward(xr, params))
    err_r = float(jnp.max(jnp.abs(out_r - ref[:7])))
    assert out_r.shape == (7, out_features)
    assert jnp.allclose(out_r, ref[:7], atol=2e-2, rtol=2e-2), \
        f"ragged path mismatch vs reference (max abs err {err_r})"

    # 3) Frozen-adapter inference path: W_eff folded once, plain GEMM kernel.
    params_f = prepare_lora_params(w_base, b_base, lora_A, lora_B,
                                   alpha=alpha, fold_lora=True)
    out_f = jax.block_until_ready(lora_adapter_forward(x, params_f))
    err_f = float(jnp.max(jnp.abs(out_f - ref)))
    assert jnp.allclose(out_f, ref, atol=2e-2, rtol=2e-2), \
        f"folded path mismatch vs reference (max abs err {err_f})"

    print("KERNEL_OK")
</pallas_src>

<mosaic_0001>
module attributes {stable_mosaic.version = 11 : i64} {
  func.func @_lora_kernel(%arg0: i32, %arg1: i32, %arg2: i32, %arg3: memref<16x128xbf16, #tpu.memory_space<vmem>>, %arg4: memref<128x128xbf16, #tpu.memory_space<vmem>>, %arg5: memref<1x128xf32, #tpu.memory_space<vmem>>, %arg6: memref<16x4xbf16, #tpu.memory_space<vmem>>, %arg7: memref<4x128xbf16, #tpu.memory_space<vmem>>, %arg8: memref<16x128xf32, #tpu.memory_space<vmem>>, %arg9: memref<16x128xf32, #tpu.memory_space<vmem>>) attributes {dimension_semantics = [#tpu.dimension_semantics<parallel>, #tpu.dimension_semantics<parallel>, #tpu.dimension_semantics<arbitrary>], iteration_bounds = array<i64: 1, 1, 1>, scalar_prefetch = 0 : i64, scratch_operands = 1 : i64, tpu.core_type = #tpu.core_type<tc>, window_params = [{transform_indices = @transform_0, window_bounds = array<i64: 16, 128>}, {transform_indices = @transform_1, window_bounds = array<i64: 128, 128>}, {transform_indices = @transform_2, window_bounds = array<i64: 1, 128>}, {transform_indices = @transform_3, window_bounds = array<i64: 16, 4>}, {transform_indices = @transform_4, window_bounds = array<i64: 4, 128>}, {transform_indices = @transform_5, window_bounds = array<i64: 16, 128>}]} {
    %c0_i32 = arith.constant 0 : i32
    %0 = arith.cmpi eq, %arg2, %c0_i32 : i32
    %1 = arith.extui %0 : i1 to i32
    %c0_i32_0 = arith.constant 0 : i32
    %2 = arith.cmpi ne, %1, %c0_i32_0 : i32
    scf.if %2 {
      %c0_10 = arith.constant 0 : index
      %c0_11 = arith.constant 0 : index
      %12 = vector.load %arg5[%c0_10, %c0_11] : memref<1x128xf32, #tpu.memory_space<vmem>>, vector<1x128xf32>
      %13 = vector.shape_cast %12 : vector<1x128xf32> to vector<1x128xf32>
      %14 = vector.broadcast %13 : vector<1x128xf32> to vector<16x128xf32>
      %c0_12 = arith.constant 0 : index
      %c0_13 = arith.constant 0 : index
      %15 = vector.load %arg9[%c0_12, %c0_13] : memref<16x128xf32, #tpu.memory_space<vmem>>, vector<16x128xf32>
      tpu.vector_store %arg9[%c0_12, %c0_13], %14 {strides = array<i32>} : memref<16x128xf32, #tpu.memory_space<vmem>>, vector<16x128xf32>,
    } else {
    }
    %c0 = arith.constant 0 : index
    %c0_1 = arith.constant 0 : index
    %3 = vector.load %arg9[%c0, %c0_1] : memref<16x128xf32, #tpu.memory_space<vmem>>, vector<16x128xf32>
    %c0_2 = arith.constant 0 : index
    %c0_3 = arith.constant 0 : index
    %4 = vector.load %arg3[%c0_2, %c0_3] : memref<16x128xbf16, #tpu.memory_space<vmem>>, vector<16x128xbf16>
    %c0_4 = arith.constant 0 : index
    %c0_5 = arith.constant 0 : index
    %5 = vector.load %arg4[%c0_4, %c0_5] : memref<128x128xbf16, #tpu.memory_space<vmem>>, vector<128x128xbf16>
    %cst = arith.constant dense<0.000000e+00> : vector<16x128xf32>
    %6 = tpu.matmul %4, %5, %cst {dimension_numbers = #tpu.dot_dimension_numbers<[1], [0], [0], [1], [0, 0, 1, 1], [], []>} : vector<16x128xbf16>, vector<128x128xbf16>, vector<16x128xf32> -> vector<16x128xf32>
    %7 = arith.addf %3, %6 : vector<16x128xf32>
    %c0_6 = arith.constant 0 : index
    %c0_7 = arith.constant 0 : index
    %8 = vector.load %arg9[%c0_6, %c0_7] : memref<16x128xf32, #tpu.memory_space<vmem>>, vector<16x128xf32>
    tpu.vector_store %arg9[%c0_6, %c0_7], %7 {strides = array<i32>} : memref<16x128xf32, #tpu.memory_space<vmem>>, vector<16x128xf32>,
    %c0_i32_8 = arith.constant 0 : i32
    %9 = arith.cmpi eq, %arg2, %c0_i32_8 : i32
    %10 = arith.extui %9 : i1 to i32
    %c0_i32_9 = arith.constant 0 : i32
    %11 = arith.cmpi ne, %10, %c0_i32_9 : i32
    scf.if %11 {
      %c0_10 = arith.constant 0 : index
      %c0_11 = arith.constant 0 : index
      %12 = vector.load %arg6[%c0_10, %c0_11] : memref<16x4xbf16, #tpu.memory_space<vmem>>, vector<16x4xbf16>
      %c0_12 = arith.constant 0 : index
      %c0_13 = arith.constant 0 : index
      %13 = vector.load %arg7[%c0_12, %c0_13] : memref<4x128xbf16, #tpu.memory_space<vmem>>, vector<4x128xbf16>
      %cst_14 = arith.constant dense<0.000000e+00> : vector<16x128xf32>
      %14 = tpu.matmul %12, %13, %cst_14 {dimension_numbers = #tpu.dot_dimension_numbers<[1], [0], [0], [1], [0, 0, 1, 1], [], []>} : vector<16x4xbf16>, vector<4x128xbf16>, vector<16x128xf32> -> vector<16x128xf32>
      %c0_15 = arith.constant 0 : index
      %c0_16 = arith.constant 0 : index
      %15 = vector.load %arg9[%c0_15, %c0_16] : memref<16x128xf32, #tpu.memory_space<vmem>>, vector<16x128xf32>
      %16 = arith.addf %15, %14 : vector<16x128xf32>
      %c0_17 = arith.constant 0 : index
      %c0_18 = arith.constant 0 : index
      %17 = vector.load %arg8[%c0_17, %c0_18] : memref<16x128xf32, #tpu.memory_space<vmem>>, vector<16x128xf32>
      tpu.vector_store %arg8[%c0_17, %c0_18], %16 {strides = array<i32>} : memref<16x128xf32, #tpu.memory_space<vmem>>, vector<16x128xf32>,
    } else {
    }
    return
  }
  func.func @transform_0(%arg0: i32, %arg1: i32, %arg2: i32) -> (i32, i32) {
    %c0_i32 = arith.constant 0 : i32
    return %arg0, %arg2 : i32, i32
  }
  func.func @transform_1(%arg0: i32, %arg1: i32, %arg2: i32) -> (i32, i32) {
    %c0_i32 = arith.constant 0 : i32
    return %arg2, %arg1 : i32, i32
  }
  func.func @transform_2(%arg0: i32, %arg1: i32, %arg2: i32) -> (i32, i32) {
    %c0_i32 = arith.constant 0 : i32
    %c0_i32_0 = arith.constant 0 : i32
    return %c0_i32, %arg1 : i32, i32
  }
  func.func @transform_3(%arg0: i32, %arg1: i32, %arg2: i32) -> (i32, i32) {
    %c0_i32 = arith.constant 0 : i32
    %c0_i32_0 = arith.constant 0 : i32
    return %arg0, %c0_i32 : i32, i32
  }
  func.func @transform_4(%arg0: i32, %arg1: i32, %arg2: i32) -> (i32, i32) {
    %c0_i32 = arith.constant 0 : i32
    %c0_i32_0 = arith.constant 0 : i32
    return %c0_i32, %arg1 : i32, i32
  }
  func.func @transform_5(%arg0: i32, %arg1: i32, %arg2: i32) -> (i32, i32) {
    %c0_i32 = arith.constant 0 : i32
    return %arg0, %arg1 : i32, i32
  }
}

</mosaic_0001>

<bundles_post_ra>
// kernel: tpu_custom_call.1
= control target key start
LH: loop header
LB: loop body
LE: loop exit
PB: predicated region body
PF: predicated region fallthrough
CT: control target
= control target key end

     0   :  { %10 = vsyncpa [#allocation4], 0  ;;  %s444_s0 = inlined_call_operand.vmem [shape: bf16[16,128], index: 0, kind: input, shape index: {}]   ;;  %s445_s1 = inlined_call_operand.hbm [shape: bf16[128,128], index: 1, kind: input, shape index: {}]   ;;  %s446_s2 = inlined_call_operand.vmem [shape: f32[1,128], index: 2, kind: input, shape index: {}]   ;;  %s447_s3 = inlined_call_operand.vmem [shape: bf16[16,4], index: 3, kind: input, shape index: {}]   ;;  %s448_s4 = inlined_call_operand.vmem [shape: bf16[4,128], index: 4, kind: input, shape index: {}]   ;;  %s449_s5 = inlined_call_operand.hbm [shape: f32[16,128], index: 5, kind: output, shape index: {}]  }
   0x1   :  { %11 = vsyncpa [#allocation5], 0  ;;  %s370_s18 = smov [#allocation3]   ;;  %s322_s22 = scalar_lea.hbm %s445_s1, 1024 }
   0x2   :  { %s19_s19 = sshll.u32 %s370_s18, 4  ;;  %p323_p0 = scmp.ne.s32.totalorder %s445_s1, %s322_s22  ;;  %s20_s19 = int_to_ptr.vmem [resolvable:$true] %s19_s19 }
   0x3   :  { %p326_p1 = scmp.lt.u32.totalorder %s322_s22, %s445_s1 }
   0x5   :  { %p328_p2 = pnand %p326_p1, %p323_p0 }
   0x7   :  { %331 = shalt.err (!%p328_p2)
}
   0x8   :  { %s332_s27 = scalar_lea.vmem %s20_s19, 1024  ;;  %p337_p4 = scmp.lt.s32.totalorder %s20_s19, %s20_s19 }
   0x9   :  { %p333_p3 = scmp.ne.s32.totalorder %s20_s19, %s332_s27  ;;  %p338_p5 = scmp.lt.s32.totalorder %s332_s27, %s332_s27 }
   0xb   :  { %p339_p6 = por %p338_p5, %p337_p4 }
   0xd   :  { %p340_p7 = pnand %p339_p6, %p333_p3 }
   0xf   :  { %343 = shalt.err (!%p340_p7)
}
  0x10   :  { %s371_s28 = smov 64   ;;  %s372_s29 = smov 4  }
  0x11   :  { %25 = dma.hbm_to_vmem [thread:$0]  %s445_s1, 1024, %s20_s19, [#allocation4], %s371_s28, %s371_s28, %s372_s29  }
  0x12   :  { %366 = dma.done.wait [#allocation4], 1024  }
  0x13   :  { %367 = vsyncadd [#allocation4], 4294966272  ;;  %v373_v0 = vmov 0.0   ;;  %vm374_vm0 = vmmov 0   ;;  %v312_v1 = vld [vmem:[#allocation3] sm:$0xff]   ;;  %v313_v2 = vld [vmem:[#allocation3 + $0x8] sm:$0xff]  }
  0x14   :  { %274 = vmatprep.subr.bf16.mxu1 %v373_v0  ;;  %294 = vmatprep.subr.bf16.mxu0 %v373_v0  ;;  %vm183_vm1 = vcmask 1041408   ;;  %v314_v3 = vld [vmem:[#allocation3 + $0x10] sm:$0xff]   ;;  %v173_v4 = vld [vmem:[%s448_s4] sm:$0x3]  ;;  %vm179_vm2 = vcmask 31744   ;;  %v315_v7 = vld [vmem:[#allocation3 + $0x18] sm:$0xff]  }
  0x15   :  { %296 = vmatprep.mubr.msk.bf16.mxu0 %vm374_vm0, %v373_v0  ;;  %290 = vmatprep.mubr.msk.bf16.mxu1 %vm374_vm0, %v373_v0  ;;  %v185_v5 = vsel %vm183_vm1, %v173_v4, 0  ;;  %v320_v6 = vld [vmem:[%s447_s3] sm:$0xff]   ;;  %v317_v9 = vld [vmem:[#allocation3 + $0x28] sm:$0xff]   ;;  %v318_v10 = vld [vmem:[#allocation3 + $0x30] sm:$0xff]   ;;  %s375_s12 = smov [#allocation6]  }
  0x16   :  { %275 = vmatpush3.bf16.msra.mxu1 %v312_v1  ;;  %295 = vmatpush3.bf16.msra.mxu0 %v185_v5  ;;  %v316_v8 = vld [vmem:[#allocation3 + $0x20] sm:$0xff]   ;;  %v319_v11 = vld [vmem:[#allocation3 + $0x38] sm:$0xff]   ;;  %s239_s13 = sshll.u32 %s375_s12, 4  ;;  %s240_s13 = int_to_ptr.vmem [resolvable:$true] %s239_s13 }
  0x17   :  { %276 = vmatprep.subr.bf16.mxu1 %v373_v0  ;;  %v321_v12 = vld [vmem:[%s444_s0] sm:$0xff]   ;;  %s344_s0 = scalar_lea.vmem %s240_s13, 256  ;;  %p349_p9 = scmp.lt.s32.totalorder %s240_s13, %s240_s13 }
  0x18   :  { %v251_v17 = vld [vmem:[%s446_s2] ss:$0 sm:$0xff]  ;;  %p345_p8 = scmp.ne.s32.totalorder %s240_s13, %s344_s0  ;;  %p350_p10 = scmp.lt.s32.totalorder %s344_s0, %s344_s0 }
  0x19   :  { %297 = vmatmul.mubr.msk.bf16.vlgmr.msra.gmra.mrb[0].mxu0 %vm179_vm2, %v320_v6 }
  0x1a   :  { %277 = vmatpush3.bf16.msra.mxu1 %v313_v2  ;;  %p351_p11 = por %p350_p10, %p349_p9 }
  0x1b   :  { %278 = vmatprep.subr.bf16.mxu1 %v373_v0 }
  0x1c   :  { %p352_p12 = pnand %p351_p11, %p345_p8 }
  0x1e   :  { %279 = vmatpush3.bf16.msra.mxu1 %v314_v3 }
  0x1f   :  { %280 = vmatprep.subr.bf16.mxu1 %v373_v0 }
  0x22   :  { %281 = vmatpush3.bf16.msra.mxu1 %v315_v7 }
  0x23   :  { %282 = vmatprep.subr.bf16.mxu1 %v373_v0 }
  0x26   :  { %283 = vmatpush3.bf16.msra.mxu1 %v316_v8 }
  0x27   :  { %284 = vmatprep.subr.bf16.mxu1 %v373_v0 }
  0x2a   :  { %285 = vmatpush3.bf16.msra.mxu1 %v317_v9 }
  0x2b   :  { %286 = vmatprep.subr.bf16.mxu1 %v373_v0 }
  0x2e   :  { %287 = vmatpush3.bf16.msra.mxu1 %v318_v10 }
  0x2f   :  { %288 = vmatprep.subr.bf16.mxu1 %v373_v0 }
  0x32   :  { %289 = vmatpush3.bf16.msra.mxu1 %v319_v11 }
  0x35   :  { %291 = vmatmul.mubr.bf16.vlgmr.msra.gmra.mrb[0].mxu1 %v321_v12 }
  0xec   :  { %v221_v13 = vpop.f32.mrb[0].mxu0 }
  0xed   :  { %v298_v14 = vpop.f32.mrb[1].mxu0 }
  0xee   :  { %v224_v15 = vpop.f32.mrb[2].mxu0 }
  0xef   :  { %v299_v16 = vpop.f32.mrb[3].mxu0 }
 0x108   :  { %v157_v18 = vpop.f32.mrb[0].mxu1 }
 0x109   :  { %v164_v19 = vadd.f32 %v251_v17, %v157_v18  ;;  %v292_v20 = vpop.f32.mrb[1].mxu1 }
 0x10a   :  { %v160_v21 = vpop.f32.mrb[2].mxu1 }
 0x10b   :  { %v230_v22 = vadd.f32 %v221_v13, %v164_v19  ;;  %v165_v23 = vadd.f32 %v251_v17, %v160_v21  ;;  %v293_v24 = vpop.f32.mrb[3].mxu1 }
 0x10d   :  { %232 = vst [vmem:[#allocation6] sm:$0xff] %v230_v22  ;;  %v231_v25 = vadd.f32 %v224_v15, %v165_v23 }
 0x10f   :  { %233 = vst [vmem:[#allocation6 + $0x8] sm:$0xff] %v231_v25 }
 0x110   :  { %355 = shalt.err (!%p352_p12)
}
 0x111   :  { %s356_s15 = scalar_lea.hbm %s449_s5, 256 }
 0x112   :  { %p357_p13 = scmp.ne.s32.totalorder %s449_s5, %s356_s15  ;;  %p360_p0 = scmp.lt.u32.totalorder %s356_s15, %s449_s5 }
 0x114   :  { %p362_p1 = pnand %p360_p0, %p357_p13 }
 0x116   :  { %365 = shalt.err (!%p362_p1)
}
 0x117   :  { %s376_s20 = smov 128   ;;  %s377_s21 = smov 8  }
 0x118   :  { %245 = dma.vmem_to_hbm [thread:$0]  %s240_s13, 256, %s449_s5, [#allocation5], %s376_s20, %s376_s20, %s377_s21  }
 0x119   :  { %368 = dma.done.wait [#allocation5], 256  }
 0x11a   :  { %369 = vsyncadd [#allocation5], 4294967040 }
 0x11b   :  { %249 = vsyncpa [#allocation4], 1 }
 0x11c   :  { %250 = vsyncpa [#allocation5], 1 }

</bundles_post_ra>
